<compile_context>
chip_gen: v7x
topology: tpu7x:2x2x1
jax: 0.10.0
libtpu: 0.0.40
codegen_flags: <defaults>
</compile_context>

<pallas_src>
import functools

import jax
import jax.numpy as jnp
from jax.experimental import pallas as pl
from jax.experimental.pallas import tpu as pltpu


def _e2e_kernel(xv_ref, w1_ref, w2_ref, o_ref, cvec_ref, *, compute_dtype):
    # xv_ref  : (C*H, W)      full x for this batch element, natural layout (one DMA / batch)
    # w1_ref  : (C, Pt, W)    cnn1 (1, d) conv weights for this plane tile, resident
    # w2_ref  : (Pt, C*H)     cnn2 (node_num, 1) conv weights, flattened, resident
    # o_ref   : (Pt, Ht, W)   output tile for node rows [h0, h0+Ht)
    # cvec_ref: (Pt, W) f32   scratch: cnn2 result for this (batch, plane tile)
    C, Pt, W = w1_ref.shape
    CH = xv_ref.shape[0]
    H = CH // C
    Ht = o_ref.shape[1]
    h_idx = pl.program_id(2)

    # cnn2: cvec[p, w] = sum_{c,h} x[c,h,w] * W2[p,c,h].  Needs all H rows of x, so it is
    # computed once per (batch, plane-tile) at the first node tile and cached in scratch.
    @pl.when(h_idx == 0)
    def _():
        xb = xv_ref[...].astype(compute_dtype)                       # (C*H, W)
        cvec_ref[...] = jnp.dot(w2_ref[...], xb,
                                preferred_element_type=jnp.float32)  # (Pt, W)

    # cnn1 for this node tile: a_t[p, hh] = sum_{c,w} x[c, h0+hh, w] * W1[p,c,w].
    # Static (small) channel loop; each channel is an NT matmul contracting over W with
    # f32 accumulation.  Per-channel sublane slices are layout-free because H % 8 == 0
    # and Ht % 8 == 0 (asserted in the wrapper).
    h0 = pl.multiple_of(h_idx * Ht, Ht)
    a_t = jnp.zeros((Pt, Ht), jnp.float32)
    for c in range(C):
        x_c = xv_ref[pl.ds(c * H + h0, Ht), :].astype(compute_dtype)  # (Ht, W)
        a_t = a_t + jax.lax.dot_general(
            w1_ref[c], x_c,
            dimension_numbers=(((1,), (1,)), ((), ())),
            preferred_element_type=jnp.float32)                       # (Pt, Ht)

    # Epilogue: out[p, hh, w] = a_t[p, hh] + cvec[p, w].  Pure VPU broadcast-add
    # (co-issues with the MXU work); no replication matmuls, no giant 0/1 matrices.
    o = a_t[:, :, None] + cvec_ref[...][:, None, :]                   # (Pt, Ht, W) f32
    o_ref[...] = o.astype(o_ref.dtype)


def e2e_block(x, w1, w2, *, node_block=None, plane_block=None,
              compute_dtype=None, vmem_limit_bytes=None):
    """E2EBlock forward. x: (N, C, H, W); w1: (P, C, 1, W); w2: (P, C, H, 1).

    node_block:    node_num rows per output tile (multiple of 8, or H).  Default picks
                   H//2 when legal so the toy shape still runs a multi-step pipelined grid.
    plane_block:   planes per tile (multiple of 8, or P).  Default P; at production sizes
                   shrink it (together with node_block) so blocks fit v7x's 64 MiB VMEM.
    compute_dtype: dtype of the conv matmul operands (jnp.bfloat16 on v6e/v7x for 2x MXU
                   rate / half the weight DMA); accumulation and output stay f32.
    vmem_limit_bytes: forwarded to pltpu.CompilerParams for large production tilings.
    """
    N, C, H, W = x.shape                    # H = node_num, W = d
    P = w1.shape[0]                         # planes
    assert w1.shape == (P, C, 1, W) and w2.shape == (P, C, H, 1)
    # Review correctness note: per-channel sublane slices of the (C*H, W) x block are only
    # layout-free when H is a multiple of the f32 sublane tile (8).
    assert H % 8 == 0, "node_num must be a multiple of 8 (f32 sublane tile)"

    Ht = node_block
    if Ht is None:
        Ht = H // 2 if (H % 2 == 0 and (H // 2) % 8 == 0) else H
    assert H % Ht == 0 and (Ht % 8 == 0 or Ht == H), "node_block must divide H and be 8-aligned"

    Pt = P if plane_block is None else plane_block
    assert P % Pt == 0 and (Pt % 8 == 0 or Pt == P), "plane_block must divide P and be 8-aligned"

    cdt = x.dtype if compute_dtype is None else compute_dtype

    # Free, contiguous reshape of x (no HBM copy) — the kernel reads x once per batch elem.
    xv = x.reshape(N, C * H, W)
    # Weight repacking is tiny; cast in the wrapper so the DMA'd weight bytes shrink.
    w1_3 = jnp.transpose(w1[:, :, 0, :], (1, 0, 2)).astype(cdt)      # (C, P, W)
    w2f = w2.reshape(P, C * H).astype(cdt)                           # (P, C*H)

    grid = (N, P // Pt, H // Ht)            # (parallel, parallel, arbitrary)

    # NOTE (production, node_num=d~400, planes~64, C~32): shrink Pt/Ht so the double-
    # buffered output tiles plus the resident x block fit VMEM (v7x: 64 MiB physical,
    # v5e/v6e: 128 MiB) and set vmem_limit_bytes with headroom.  On v7x, keep the big x
    # input at the default pipeline depth (2) — or switch it to pl.ANY + a manual copy —
    # and spend extra buffering on the small output tiles instead.
    out = pl.pallas_call(
        functools.partial(_e2e_kernel, compute_dtype=cdt),
        out_shape=jax.ShapeDtypeStruct((N, P, H, W), x.dtype),
        grid=grid,
        in_specs=[
            # x: constant block index over (plane, node) axes -> fetched once per batch elem.
            pl.BlockSpec((None, C * H, W), lambda b, p, h: (b, 0, 0)),
            pl.BlockSpec((C, Pt, W), lambda b, p, h: (0, p, 0)),      # w1, resident per tile
            pl.BlockSpec((Pt, C * H), lambda b, p, h: (p, 0)),        # w2, resident per tile
        ],
        out_specs=pl.BlockSpec((None, Pt, Ht, W), lambda b, p, h: (b, p, h, 0)),
        scratch_shapes=[pltpu.VMEM((Pt, W), jnp.float32)],            # cached cnn2 result
        compiler_params=pltpu.CompilerParams(
            dimension_semantics=("parallel", "parallel", "arbitrary"),
            vmem_limit_bytes=vmem_limit_bytes),
    )(xv, w1_3, w2f)
    return out


def _reference(x, w1, w2):
    # Pure-JAX reference of the PyTorch forward (bias=False).
    a = jnp.einsum('ncij,pcj->npi', x, w1[:, :, 0, :])   # cnn1, (N, P, node_num)
    b = jnp.einsum('ncij,pci->npj', x, w2[:, :, :, 0])   # cnn2, (N, P, d)
    return a[:, :, :, None] + b[:, :, None, :]


if __name__ == "__main__":
    # Small shapes consistent with the module: in_planes=4, planes=8, node_num=16, d=16.
    N, in_planes, planes, node_num, d = 2, 4, 8, 16, 16

    key = jax.random.PRNGKey(0)
    kx, k1, k2 = jax.random.split(key, 3)
    x = jax.random.normal(kx, (N, in_planes, node_num, d), dtype=jnp.float32)
    w1 = jax.random.normal(k1, (planes, in_planes, 1, d), dtype=jnp.float32) * 0.1
    w2 = jax.random.normal(k2, (planes, in_planes, node_num, 1), dtype=jnp.float32) * 0.1

    ref = _reference(x, w1, w2)

    # f32 path: 4-step grid (2 batch x 1 plane-tile x 2 node-tiles), pipelined.
    out = jax.block_until_ready(e2e_block(x, w1, w2))
    assert out.shape == (N, planes, node_num, d)
    assert jnp.allclose(out, ref, atol=1e-4, rtol=1e-4)

    # bf16 MXU-operand path (v6e/v7x); accumulation / broadcast-add / store stay f32.
    out_bf16 = jax.block_until_ready(e2e_block(x, w1, w2, compute_dtype=jnp.bfloat16))
    assert out_bf16.shape == (N, planes, node_num, d)
    assert jnp.allclose(out_bf16, ref, atol=5e-2, rtol=5e-2)

    print("KERNEL_OK")
</pallas_src>

<mosaic_0001>
module attributes {stable_mosaic.version = 11 : i64} {
  func.func @_e2e_kernel(%arg0: i32, %arg1: i32, %arg2: i32, %arg3: memref<1x64x16xf32, #tpu.memory_space<vmem>>, %arg4: memref<4x8x16xf32, #tpu.memory_space<vmem>>, %arg5: memref<8x64xf32, #tpu.memory_space<vmem>>, %arg6: memref<1x8x8x16xf32, #tpu.memory_space<vmem>>, %arg7: memref<8x16xf32, #tpu.memory_space<vmem>>) attributes {dimension_semantics = [#tpu.dimension_semantics<parallel>, #tpu.dimension_semantics<parallel>, #tpu.dimension_semantics<arbitrary>], iteration_bounds = array<i64: 2, 1, 2>, scalar_prefetch = 0 : i64, scratch_operands = 1 : i64, tpu.core_type = #tpu.core_type<tc>, window_params = [{transform_indices = @transform_0, window_bounds = array<i64: 1, 64, 16>}, {transform_indices = @transform_1, window_bounds = array<i64: 4, 8, 16>}, {transform_indices = @transform_2, window_bounds = array<i64: 8, 64>}, {transform_indices = @transform_3, window_bounds = array<i64: 1, 8, 8, 16>}]} {
    %c0_i32 = arith.constant 0 : i32
    %0 = arith.cmpi eq, %arg2, %c0_i32 : i32
    %1 = arith.extui %0 : i1 to i32
    %c0_i32_0 = arith.constant 0 : i32
    %2 = arith.cmpi ne, %1, %c0_i32_0 : i32
    scf.if %2 {
      %c0_28 = arith.constant 0 : index
      %c0_29 = arith.constant 0 : index
      %c0_30 = arith.constant 0 : index
      %47 = vector.load %arg3[%c0_28, %c0_29, %c0_30] : memref<1x64x16xf32, #tpu.memory_space<vmem>>, vector<1x64x16xf32>
      %48 = vector.shape_cast %47 : vector<1x64x16xf32> to vector<64x16xf32>
      %c0_31 = arith.constant 0 : index
      %c0_32 = arith.constant 0 : index
      %49 = vector.load %arg5[%c0_31, %c0_32] : memref<8x64xf32, #tpu.memory_space<vmem>>, vector<8x64xf32>
      %cst_33 = arith.constant dense<0.000000e+00> : vector<8x16xf32>
      %50 = tpu.matmul %49, %48, %cst_33 {dimension_numbers = #tpu.dot_dimension_numbers<[1], [0], [0], [1], [0, 0, 1, 1], [], []>} : vector<8x64xf32>, vector<64x16xf32>, vector<8x16xf32> -> vector<8x16xf32>
      %c0_34 = arith.constant 0 : index
      %c0_35 = arith.constant 0 : index
      %51 = vector.load %arg7[%c0_34, %c0_35] : memref<8x16xf32, #tpu.memory_space<vmem>>, vector<8x16xf32>
      tpu.vector_store %arg7[%c0_34, %c0_35], %50 {strides = array<i32>} : memref<8x16xf32, #tpu.memory_space<vmem>>, vector<8x16xf32>,
    } else {
    }
    %c8_i32 = arith.constant 8 : i32
    %3 = arith.muli %arg2, %c8_i32 : i32
    %4 = tpu.assume_multiple %3, 8 : i32
    %cst = arith.constant 0.000000e+00 : f32
    %5 = vector.broadcast %cst : f32 to vector<8x8xf32>
    %c0_i32_1 = arith.constant 0 : i32
    %6 = arith.addi %c0_i32_1, %4 : i32
    %c0 = arith.constant 0 : index
    %7 = arith.index_cast %6 : i32 to index
    %c0_2 = arith.constant 0 : index
    %8 = vector.load %arg3[%c0, %7, %c0_2] : memref<1x64x16xf32, #tpu.memory_space<vmem>>, vector<1x8x16xf32>
    %9 = vector.shape_cast %8 : vector<1x8x16xf32> to vector<8x16xf32>
    %c0_3 = arith.constant 0 : index
    %c0_4 = arith.constant 0 : index
    %c0_5 = arith.constant 0 : index
    %10 = vector.load %arg4[%c0_3, %c0_4, %c0_5] : memref<4x8x16xf32, #tpu.memory_space<vmem>>, vector<1x8x16xf32>
    %11 = vector.shape_cast %10 : vector<1x8x16xf32> to vector<8x16xf32>
    %cst_6 = arith.constant dense<0.000000e+00> : vector<8x8xf32>
    %12 = tpu.matmul %11, %9, %cst_6 {dimension_numbers = #tpu.dot_dimension_numbers<[1], [1], [0], [0], [0, 0, 1, 0], [], []>} : vector<8x16xf32>, vector<8x16xf32>, vector<8x8xf32> -> vector<8x8xf32>
    %13 = arith.addf %5, %12 : vector<8x8xf32>
    %c16_i32 = arith.constant 16 : i32
    %14 = arith.addi %c16_i32, %4 : i32
    %c0_7 = arith.constant 0 : index
    %15 = arith.index_cast %14 : i32 to index
    %c0_8 = arith.constant 0 : index
    %16 = vector.load %arg3[%c0_7, %15, %c0_8] : memref<1x64x16xf32, #tpu.memory_space<vmem>>, vector<1x8x16xf32>
    %17 = vector.shape_cast %16 : vector<1x8x16xf32> to vector<8x16xf32>
    %c1 = arith.constant 1 : index
    %c0_9 = arith.constant 0 : index
    %c0_10 = arith.constant 0 : index
    %18 = vector.load %arg4[%c1, %c0_9, %c0_10] : memref<4x8x16xf32, #tpu.memory_space<vmem>>, vector<1x8x16xf32>
    %19 = vector.shape_cast %18 : vector<1x8x16xf32> to vector<8x16xf32>
    %cst_11 = arith.constant dense<0.000000e+00> : vector<8x8xf32>
    %20 = tpu.matmul %19, %17, %cst_11 {dimension_numbers = #tpu.dot_dimension_numbers<[1], [1], [0], [0], [0, 0, 1, 0], [], []>} : vector<8x16xf32>, vector<8x16xf32>, vector<8x8xf32> -> vector<8x8xf32>
    %21 = arith.addf %13, %20 : vector<8x8xf32>
    %c32_i32 = arith.constant 32 : i32
    %22 = arith.addi %c32_i32, %4 : i32
    %c0_12 = arith.constant 0 : index
    %23 = arith.index_cast %22 : i32 to index
    %c0_13 = arith.constant 0 : index
    %24 = vector.load %arg3[%c0_12, %23, %c0_13] : memref<1x64x16xf32, #tpu.memory_space<vmem>>, vector<1x8x16xf32>
    %25 = vector.shape_cast %24 : vector<1x8x16xf32> to vector<8x16xf32>
    %c2 = arith.constant 2 : index
    %c0_14 = arith.constant 0 : index
    %c0_15 = arith.constant 0 : index
    %26 = vector.load %arg4[%c2, %c0_14, %c0_15] : memref<4x8x16xf32, #tpu.memory_space<vmem>>, vector<1x8x16xf32>
    %27 = vector.shape_cast %26 : vector<1x8x16xf32> to vector<8x16xf32>
    %cst_16 = arith.constant dense<0.000000e+00> : vector<8x8xf32>
    %28 = tpu.matmul %27, %25, %cst_16 {dimension_numbers = #tpu.dot_dimension_numbers<[1], [1], [0], [0], [0, 0, 1, 0], [], []>} : vector<8x16xf32>, vector<8x16xf32>, vector<8x8xf32> -> vector<8x8xf32>
    %29 = arith.addf %21, %28 : vector<8x8xf32>
    %c48_i32 = arith.constant 48 : i32
    %30 = arith.addi %c48_i32, %4 : i32
    %c0_17 = arith.constant 0 : index
    %31 = arith.index_cast %30 : i32 to index
    %c0_18 = arith.constant 0 : index
    %32 = vector.load %arg3[%c0_17, %31, %c0_18] : memref<1x64x16xf32, #tpu.memory_space<vmem>>, vector<1x8x16xf32>
    %33 = vector.shape_cast %32 : vector<1x8x16xf32> to vector<8x16xf32>
    %c3 = arith.constant 3 : index
    %c0_19 = arith.constant 0 : index
    %c0_20 = arith.constant 0 : index
    %34 = vector.load %arg4[%c3, %c0_19, %c0_20] : memref<4x8x16xf32, #tpu.memory_space<vmem>>, vector<1x8x16xf32>
    %35 = vector.shape_cast %34 : vector<1x8x16xf32> to vector<8x16xf32>
    %cst_21 = arith.constant dense<0.000000e+00> : vector<8x8xf32>
    %36 = tpu.matmul %35, %33, %cst_21 {dimension_numbers = #tpu.dot_dimension_numbers<[1], [1], [0], [0], [0, 0, 1, 0], [], []>} : vector<8x16xf32>, vector<8x16xf32>, vector<8x8xf32> -> vector<8x8xf32>
    %37 = arith.addf %29, %36 : vector<8x8xf32>
    %38 = vector.shape_cast %37 : vector<8x8xf32> to vector<8x8x1xf32>
    %c0_22 = arith.constant 0 : index
    %c0_23 = arith.constant 0 : index
    %39 = vector.load %arg7[%c0_22, %c0_23] : memref<8x16xf32, #tpu.memory_space<vmem>>, vector<8x16xf32>
    %40 = vector.shape_cast %39 : vector<8x16xf32> to vector<8x1x16xf32>
    %41 = vector.broadcast %38 : vector<8x8x1xf32> to vector<8x8x16xf32>
    %42 = vector.broadcast %40 : vector<8x1x16xf32> to vector<8x8x16xf32>
    %43 = arith.addf %41, %42 : vector<8x8x16xf32>
    %c0_24 = arith.constant 0 : index
    %c0_25 = arith.constant 0 : index
    %c0_26 = arith.constant 0 : index
    %c0_27 = arith.constant 0 : index
    %44 = vector.load %arg6[%c0_24, %c0_25, %c0_26, %c0_27] : memref<1x8x8x16xf32, #tpu.memory_space<vmem>>, vector<1x8x8x16xf32>
    %45 = vector.shape_cast %44 : vector<1x8x8x16xf32> to vector<8x8x16xf32>
    %46 = vector.shape_cast %43 : vector<8x8x16xf32> to vector<1x8x8x16xf32>
    tpu.vector_store %arg6[%c0_24, %c0_25, %c0_26, %c0_27], %46 {strides = array<i32>} : memref<1x8x8x16xf32, #tpu.memory_space<vmem>>, vector<1x8x8x16xf32>,
    return
  }
  func.func @transform_0(%arg0: i32, %arg1: i32, %arg2: i32) -> (i32, i32, i32) {
    %c0_i32 = arith.constant 0 : i32
    %c0_i32_0 = arith.constant 0 : i32
    %c0_i32_1 = arith.constant 0 : i32
    return %arg0, %c0_i32, %c0_i32_0 : i32, i32, i32
  }
  func.func @transform_1(%arg0: i32, %arg1: i32, %arg2: i32) -> (i32, i32, i32) {
    %c0_i32 = arith.constant 0 : i32
    %c0_i32_0 = arith.constant 0 : i32
    %c0_i32_1 = arith.constant 0 : i32
    return %c0_i32, %arg1, %c0_i32_0 : i32, i32, i32
  }
  func.func @transform_2(%arg0: i32, %arg1: i32, %arg2: i32) -> (i32, i32) {
    %c0_i32 = arith.constant 0 : i32
    %c0_i32_0 = arith.constant 0 : i32
    return %arg1, %c0_i32 : i32, i32
  }
  func.func @transform_3(%arg0: i32, %arg1: i32, %arg2: i32) -> (i32, i32, i32, i32) {
    %c0_i32 = arith.constant 0 : i32
    %c0_i32_0 = arith.constant 0 : i32
    return %arg0, %arg1, %arg2, %c0_i32 : i32, i32, i32, i32
  }
}

</mosaic_0001>

<bundles_post_ra>
// kernel: tpu_custom_call.1
= control target key start
LH: loop header
LB: loop body
LE: loop exit
PB: predicated region body
PF: predicated region fallthrough
CT: control target
= control target key end

     0   :  { %8 = vsyncpa [#allocation4], 0  ;;  %s1471_s0 = inlined_call_operand.vmem [shape: f32[2,64,16], index: 0, kind: input, shape index: {}]   ;;  %s1472_s1 = inlined_call_operand.vmem [shape: f32[4,8,16], index: 1, kind: input, shape index: {}]   ;;  %s1473_s2 = inlined_call_operand.vmem [shape: f32[8,64], index: 2, kind: input, shape index: {}]   ;;  %s1474_s3 = inlined_call_operand.hbm [shape: f32[2,8,16,16], index: 3, kind: output, shape index: {}]  }
   0x1   :  { %10 = vsyncpa [#allocation4 + $0x1], 0  ;;  %s1259_s12 = smov 0   ;;  %s1261_s13 = smov 0  }
   0x2   :  { %s1263_s14 = smov 0   ;;  %s1265_s15 = smov 0  }
   0x3   :  { %s1267_s16 = smov 0   ;;  %s1269_s17 = smov 0  }
   0x4   :  { %s1271_s18 = smov 0   ;;  %s1273_s19 = smov 0  }
   0x5 LB: > { %s944_s20 = sadd.s32 4294967295, %s1227_s19   ;;  %s945_s21 = sadd.s32 4294967294, %s1227_s19   ;;  %s1227_s19 = sphi %s1273_s19, %s16_s19   ;;  %s1223_s18 = sphi %s1271_s18, %s1483_s18   ;;  %s1219_s17 = sphi %s1269_s17, %s1482_s17   ;;  %s1215_s16 = sphi %s1267_s16, %s1481_s16   ;;  %s1211_s15 = sphi %s1265_s15, %s1480_s15   ;;  %s1207_s14 = sphi %s1263_s14, %s1479_s14   ;;  %s1203_s13 = sphi %s1261_s13, %s1478_s13   ;;  %s1199_s12 = sphi %s1259_s12, %s1477_s12  }
   0x6   : > { %s28_s22 = sadd.s32 1, %s1219_s17  ;;  %s35_s23 = sadd.s32 1, %s1223_s18 }
   0x7   : > { %p29_p0 = scmp.ge.s32.totalorder %s28_s22, 2  ;;  %p134_p1 = scmp.ne.s32.totalorder %s1207_s14, %s1203_s13 }
   0x8   : > { %p135_p2 = scmp.eq.s32.totalorder %s944_s20, 3  ;;  %p140_p5 = scmp.ne.s32.totalorder %s1203_s13, %s1199_s12 }
   0x9   : > { %s1485_s22 = smov (%p29_p0, %s28_s22), 0  ;;  %s1487_s23 = smov (!%p29_p0, %s35_s23), %s1223_s18 }
   0xa   : > { %s120_s24 = ssub.s32 %s1219_s17, %s1485_s22  ;;  %p1310_p3 = por %p135_p2, %p134_p1 }
   0xb   : > { %p37_p4 = scmp.ge.s32.totalorder %s1487_s23, 2  ;;  %p141_p6 = scmp.eq.s32.totalorder %s945_s21, 3 }
   0xc   : > { %p950_p7 = scmp.ge.s32.totalorder %s1227_s19, 1  ;;  %p181_p9 = scmp.lt.s32.totalorder %s1227_s19, 5 }
   0xd   : > { %s1489_s23 = smov (%p37_p4, %s1487_s23), 0  ;;  %p1319_p8 = por %p141_p6, %p140_p5 }
   0xe   : > { %s117_s27 = ssub.s32 %s1223_s18, %s1489_s23  ;;  %s124_s28 = sadd.s32 1, %s1207_s14 }
   0xf   : > { %s121_s29 = sor.u32 %s120_s24, %s117_s27  ;;  %p182_p10 = pnand %p950_p7, %p181_p9 }
  0x10   : > { %p122_p11 = scmp.eq.s32.totalorder %s121_s29, 0  ;;  %s210_s4 = sand.u32 (!%p182_p10), 1, %s1203_s13  }
  0x11   : > { %185 = sbr.rel (%p182_p10) target bundleno = 634 (0x27a), region = 32  ;;  %p213_p12 = scmp.lt.s32.totalorder (!%p182_p10), %s1215_s16, 1 }
  0x12   : > { %s1328_s30 = scalar_select %p122_p11, %s1207_s14, %s124_s28  }
  0x13   : > { %s951_s5 = sshll.u32 (!%p182_p10), %s210_s4, 6  ;;  %p954_p13 = scmp.ne.s32.totalorder (!%p182_p10), %s1211_s15, 0 }
  0x14   : > { %s1340_s11 = scalar_lea.vmem (!%p182_p10), [#allocation3], %s951_s5 }
  0x18   : > { %s214_s6 = scalar_select %p213_p12, %s1215_s16, 1 }
  0x19   : > { %230 = sbr.rel (%p954_p13) target bundleno = 259 (0x103), region = 36  ;;  %v1229_v3 = vmov (!%p954_p13), 0.0|0.0   ;;  %vm1230_vm0 = vmmov (!%p954_p13), 0   ;;  %v1231_v6 = vmov (!%p954_p13), 0.0   ;;  %v239_v14 = vld [vmem:[%s1473_s2] sm:$0xff] (!%p954_p13)  ;;  %vm240_vm1 = vcmask (!%p954_p13), 523264  }
  0x1a   : > { %s979_s7 = sshll.u32 %s214_s6, 6  ;;  %1036 = vmatprep.subr.bf16.mxu0 (!%p954_p13), %v1229_v3  ;;  %1013 = vmatprep.mubr.msk.f32.mxu0 (!%p954_p13), %vm1230_vm0, %v1231_v6  ;;  %vm314_vm2 = vcmask (!%p954_p13), 130048  }
  0x1b   : > { %s1338_s10 = scalar_lea.vmem %s1471_s0, %s979_s7 }
  0x1c   : > { %v231_v0 = vld [vmem:[%s1338_s10] sm:$0xff] (!%p954_p13)  ;;  %v232_v1 = vld [vmem:[%s1338_s10 + $0x8] sm:$0xff] (!%p954_p13)  ;;  %v233_v2 = vld [vmem:[%s1338_s10 + $0x10] sm:$0xff] (!%p954_p13) }
  0x1d   : > { %v1037_v4 = vpack.c.bf16 (!%p954_p13), %v232_v1, %v231_v0  ;;  %v234_v5 = vld [vmem:[%s1338_s10 + $0x18] sm:$0xff] (!%p954_p13)  ;;  %v235_v8 = vld [vmem:[%s1338_s10 + $0x20] sm:$0xff] (!%p954_p13)  ;;  %v236_v9 = vld [vmem:[%s1338_s10 + $0x28] sm:$0xff] (!%p954_p13) }
  0x1e   : > { %v1040_v7 = vpack.c.bf16 (!%p954_p13), %v234_v5, %v233_v2  ;;  %v1043_v10 = vpack.c.bf16 (!%p954_p13), %v236_v9, %v235_v8  ;;  %v237_v11 = vld [vmem:[%s1338_s10 + $0x30] sm:$0xff] (!%p954_p13)  ;;  %v238_v12 = vld [vmem:[%s1338_s10 + $0x38] sm:$0xff] (!%p954_p13) }
  0x1f   : > { %1038 = vmatpush3.bf16.msra.mxu0 (!%p954_p13), %v1037_v4  ;;  %v1046_v13 = vpack.c.bf16 (!%p954_p13), %v238_v12, %v237_v11 }
  0x20   : > { %1039 = vmatprep.subr.bf16.mxu0 %v1229_v3 }
  0x23   : > { %1041 = vmatpush3.bf16.msra.mxu0 %v1040_v7 }
  0x24   : > { %1042 = vmatprep.subr.bf16.mxu0 %v1229_v3 }
  0x27   : > { %1044 = vmatpush3.bf16.msra.mxu0 %v1043_v10 }
  0x28   : > { %1045 = vmatprep.subr.bf16.mxu0 %v1229_v3 }
  0x2b   : > { %1047 = vmatpush3.bf16.msra.mxu0 %v1046_v13 }
  0x2e   : > { %1014 = vmatmul.mubr.msk.f32.vlgmr.msra.gmra.mrb[0].mxu0 %vm240_vm1, %v239_v14 }
 0x101   : > { %v310_v15 = vpop.f32.mrb[0].mxu0 }
 0x102   : > { %315 = vst.msk [vmem:[#allocation2] sm:$0xff] %vm314_vm2, %v310_v15  ;;  %v1015_v16 = vpop.f32.mrb[1].mxu0 }
 0x103 PF: > { %s956_s24 = sshll.u32 %s1211_s15, 3  ;;  %vm325_vm3 = vcmask 130048   ;;  %v1232_v17 = vmov 0.0   ;;  %vm1233_vm4 = vmmov 0   ;;  %v959_v20 = vld [vmem:[%s1472_s1 + $0x8] sm:$0xff]  ;;  %v966_v21 = vld [vmem:[%s1472_s1 + $0x10] sm:$0xff]  ;;  %v642_v26 = vlaneseq }
 0x104   : > { %1016 = vmatprep.subr.mxu1 %v1232_v17  ;;  %1026 = vmatprep.subr.mxu0 %v1232_v17  ;;  %s317_s27 = scalar_lea.vmem %s1338_s10, %s956_s24  ;;  %v319_v24 = vld [vmem:[%s1472_s1] sm:$0xff]  ;;  %v971_v25 = vld [vmem:[%s1472_s1 + $0x18] sm:$0xff]  ;;  %v1234_v49 = vmov 1966171168   ;;  %s975_s20 = sshll.u32 %s1215_s16, 4 }
 0x105   : > { %v958_v18 = vld [vmem:[%s317_s27 + $0x10] sm:$0xff]  ;;  %v965_v19 = vld [vmem:[%s317_s27 + $0x20] sm:$0xff]  ;;  %1018 = vmatprep.mubr.msk.f32.mxu1 %vm1233_vm4, %v1232_v17  ;;  %1028 = vmatprep.mubr.msk.f32.mxu0 %vm1233_vm4, %v1232_v17  ;;  %v643_v27 = vshrl.u32 %v642_v26, 7  ;;  %v702_v50 = vunpack.c.l.s4 %v1234_v49  ;;  %s820_s21 = sadd.s32 %s1211_s15, %s975_s20  ;;  %s823_s24 = sshll.u32 %s1340_s11, 4  ;;  %s1411_s24 = int_to_ptr.vmem [resolvable:$true] %s823_s24 }
 0x106   : > { %1017 = vmatpush3.xpose.msk.msra.mxu1 %vm325_vm3, %v958_v18  ;;  %1027 = vmatpush3.xpose.msk.msra.mxu0 %vm325_vm3, %v965_v19  ;;  %v318_v22 = vld [vmem:[%s317_s27] sm:$0xff]  ;;  %v970_v23 = vld [vmem:[%s317_s27 + $0x30] sm:$0xff]  ;;  %s976_s16 = sshll.u32 %s820_s21, 7  ;;  %s1419_s29 = scalar_lea.sflag [#allocation4], %s210_s4 }
 0x107   : > { %1021 = vmatprep.subr.mxu1 %v1232_v17  ;;  %1031 = vmatprep.subr.mxu0 %v1232_v17  ;;  %v658_v28 = vsub.s32 2, %v643_v27  ;;  %v1380_v29 = vsub.s32 0, %v643_v27  ;;  %v665_v37 = vsub.s32 3, %v643_v27  ;;  %v651_v38 = vsub.s32 1, %v643_v27  ;;  %s1409_s28 = scalar_lea.hbm %s1474_s3, %s976_s16  ;;  %s1133_s5 = scalar_lea.vmem %s1411_s24, 1024 }
 0x108   : > { %v679_v41 = vsub.s32 5, %v643_v27  ;;  %v672_v42 = vsub.s32 4, %v643_v27  ;;  %v693_v45 = vsub.s32 7, %v643_v27  ;;  %v686_v46 = vsub.s32 6, %v643_v27  ;;  %p1134_p0 = scmp.ne.s32.totalorder %s1411_s24, %s1133_s5  ;;  %s1235_s6 = smov [#allocation3]  }
 0x109   : > { %1019 = vmatmul.mubr.msk.f32.vlgmr.msra.gmra.mrb[0].mxu1 %vm325_vm3, %v959_v20  ;;  %1029 = vmatmul.mubr.msk.f32.vlgmr.msra.gmra.mrb[0].mxu0 %vm325_vm3, %v966_v21  ;;  %v703_v51 = vunpack.c.0.s8 %v702_v50  ;;  %v698_v53 = vld [vmem:[#allocation2] sm:$0xff]  ;;  %s1137_s7 = sshll.u32 %s1235_s6, 4  ;;  %s1138_s7 = int_to_ptr.vmem [resolvable:$false] %s1137_s7 }
 0x10a   : > { %1022 = vmatpush3.xpose.msk.msra.mxu1 %vm325_vm3, %v318_v22  ;;  %1032 = vmatpush3.xpose.msk.msra.mxu0 %vm325_vm3, %v970_v23  ;;  %v700_v55 = vcombine.high %v698_v53, %v698_v53  ;;  %p1135_p1 = pnand %p1134_p0, %p1310_p3  ;;  %s1139_s8 = scalar_lea.vmem %s1138_s7, 2048 }
 0x10b   : > { %1023 = vmatprep.mubr.msk.f32.mxu1 %vm1233_vm4, %v1232_v17  ;;  %1033 = vmatprep.mubr.msk.f32.mxu0 %vm1233_vm4, %v1232_v17  ;;  %v706_v52 = vsub.s32 %v703_v51, %v643_v27  ;;  %p1140_p4 = scmp.lt.s32.totalorder %s1411_s24, %s1138_s7  ;;  %p1141_p5 = scmp.lt.s32.totalorder %s1139_s8, %s1133_s5 }
 0x10c   : > { %p1136_p2 = pneg %p1135_p1 }
 0x10d   : > { %v707_v54 = vrot.slane %v698_v53, %v706_v52  ;;  %v714_v58 = vrot.slane %v700_v55, %v706_v52  ;;  %p1142_p6 = por %p1141_p5, %p1140_p4 }
 0x10f   : > { %v723_v56 = vrot.slane %v707_v54, %v706_v52  ;;  %v715_v57 = vcombine.high %v707_v54, %v707_v54  ;;  %v716_v61 = vcombine.high %v714_v58, %v714_v58  ;;  %v730_v4 = vrot.slane %v714_v58, %v706_v52  ;;  %p1143_p7 = pnand %p1142_p6, %p1136_p2 }
 0x111   : > { %1024 = vmatmul.mubr.msk.f32.vlgmr.msra.gmra.mrb[0].mxu1 %vm325_vm3, %v319_v24  ;;  %1034 = vmatmul.mubr.msk.f32.vlgmr.msra.gmra.mrb[0].mxu0 %vm325_vm3, %v971_v25  ;;  %v745_v59 = vcombine.high %v723_v56, %v723_v56  ;;  %v737_v60 = vrot.slane %v715_v57, %v706_v52  ;;  %v752_v63 = vrot.slane %v723_v56, %v1380_v29 }
 0x112   : > { %v744_v3 = vrot.slane %v716_v61, %v706_v52  ;;  %v768_v12 = vrot.slane %v730_v4, %v1380_v29  ;;  %v746_v16 = vcombine.high %v730_v4, %v730_v4 }
 0x113   : > { %v760_v62 = vrot.slane %v745_v59, %v1380_v29  ;;  %v747_v0 = vcombine.high %v737_v60, %v737_v60  ;;  %v756_v8 = vrot.slane %v737_v60, %v1380_v29 }
 0x114   : > { %v772_v11 = vrot.slane %v744_v3, %v1380_v29  ;;  %v748_v15 = vcombine.high %v744_v3, %v744_v3  ;;  %v776_v22 = vrot.slane %v746_v16, %v1380_v29 }
 0x115   : > { %v764_v7 = vrot.slane %v747_v0, %v1380_v29 }
 0x116   : > { %v780_v21 = vrot.slane %v748_v15, %v1380_v29 }
 0x1e4   : > { %v474_v30 = vpop.f32.mrb[0].mxu1  ;;  %v637_v31 = vpop.f32.mrb[0].mxu0 }
 0x1e5   : > { %v1048_v32 = vadd.f32 %v637_v31, %v474_v30  ;;  %v1025_v33 = vpop.f32.mrb[1].mxu1  ;;  %v1035_v34 = vpop.f32.mrb[1].mxu0 }
 0x1e7   : > { %v659_v35 = vrot.slane %v1048_v32, %v658_v28  ;;  %v645_v36 = vrot.slane %v1048_v32, %v1380_v29  ;;  %v666_v39 = vrot.slane %v1048_v32, %v665_v37  ;;  %v652_v40 = vrot.slane %v1048_v32, %v651_v38 }
 0x1e8   : > { %v680_v43 = vrot.slane %v1048_v32, %v679_v41  ;;  %v673_v44 = vrot.slane %v1048_v32, %v672_v42  ;;  %v694_v47 = vrot.slane %v1048_v32, %v693_v45  ;;  %v687_v48 = vrot.slane %v1048_v32, %v686_v46 }
 0x1e9   : > { %661 = vbcast.lane.b32.xlu1 %v659_v35, 256  ;;  %647 = vbcast.lane.b32.xlu0 %v645_v36, 256 }
 0x1ed   : > { %668 = vbcast.lane.b32.xlu1 %v666_v39, 256  ;;  %654 = vbcast.lane.b32.xlu0 %v652_v40, 256 }
 0x1f1   : > { %682 = vbcast.lane.b32.xlu1 %v680_v43, 256  ;;  %675 = vbcast.lane.b32.xlu0 %v673_v44, 256 }
 0x1f5   : > { %696 = vbcast.lane.b32.xlu1 %v694_v47, 256  ;;  %689 = vbcast.lane.b32.xlu0 %v687_v48, 256 }
 0x25b   : > { %v662_v1 = vpop.permute.xlu1 %661  ;;  %v648_v2 = vpop.permute.xlu0 %647 }
 0x25c   : > { %v791_v5 = vadd.f32 %v760_v62, %v662_v1  ;;  %v789_v6 = vadd.f32 %v752_v63, %v648_v2 }
 0x25e   : > { %799 = vst.msk [vmem:[%s1340_s11 + $0x10] sm:$0xff] %vm325_vm3, %v791_v5  ;;  %797 = vst.msk [vmem:[%s1340_s11] sm:$0xff] %vm325_vm3, %v789_v6 }
 0x25f   : > { %v669_v9 = vpop.permute.xlu1 %668  ;;  %v655_v10 = vpop.permute.xlu0 %654 }
 0x260   : > { %v792_v13 = vadd.f32 %v764_v7, %v669_v9  ;;  %v790_v14 = vadd.f32 %v756_v8, %v655_v10 }
 0x262   : > { %800 = vst.msk [vmem:[%s1340_s11 + $0x18] sm:$0xff] %vm325_vm3, %v792_v13  ;;  %798 = vst.msk [vmem:[%s1340_s11 + $0x8] sm:$0xff] %vm325_vm3, %v790_v14 }
 0x263   : > { %v683_v17 = vpop.permute.xlu1 %682  ;;  %v676_v18 = vpop.permute.xlu0 %675 }
 0x264   : > { %v794_v19 = vadd.f32 %v772_v11, %v683_v17  ;;  %v793_v20 = vadd.f32 %v768_v12, %v676_v18 }
 0x266   : > { %802 = vst.msk [vmem:[%s1340_s11 + $0x28] sm:$0xff] %vm325_vm3, %v794_v19  ;;  %801 = vst.msk [vmem:[%s1340_s11 + $0x20] sm:$0xff] %vm325_vm3, %v793_v20 }
 0x267   : > { %v697_v23 = vpop.permute.xlu1 %696  ;;  %v690_v24 = vpop.permute.xlu0 %689 }
 0x268   : > { %v796_v25 = vadd.f32 %v780_v21, %v697_v23  ;;  %v795_v26 = vadd.f32 %v776_v22, %v690_v24 }
 0x26a   : > { %804 = vst.msk [vmem:[%s1340_s11 + $0x38] sm:$0xff] %vm325_vm3, %v796_v25  ;;  %803 = vst.msk [vmem:[%s1340_s11 + $0x30] sm:$0xff] %vm325_vm3, %v795_v26 }
 0x26b   : > { %1146 = shalt.err (!%p1143_p7)
}
 0x26c   : > { %s1147_s4 = scalar_lea.hbm %s1409_s28, 1024  ;;  %s1151_s10 = scalar_lea.hbm %s1474_s3, 4096 }
 0x26d   : > { %p1148_p9 = scmp.ne.s32.totalorder %s1409_s28, %s1147_s4  ;;  %p1152_p12 = scmp.lt.u32.totalorder %s1409_s28, %s1474_s3 }
 0x26e   : > { %p1153_p13 = scmp.lt.u32.totalorder %s1151_s10, %s1147_s4  ;;  %p1155_p1 = scmp.lt.u32.totalorder %s1147_s4, %s1409_s28 }
 0x26f   : > { %p1149_p10 = pnand %p1148_p9, %p1310_p3 }
 0x270   : > { %p1154_p0 = por %p1153_p13, %p1152_p12 }
 0x271   : > { %p1150_p11 = pneg %p1149_p10 }
 0x272   : > { %p1156_p2 = por %p1155_p1, %p1154_p0 }
 0x274   : > { %p1157_p4 = pnand %p1156_p2, %p1150_p11 }
 0x276   : > { %1160 = shalt.err (!%p1157_p4)
}
 0x277   : > { %s1236_s16 = smov 128   ;;  %s1237_s15 = smov 256  }
 0x278   : > { %s1238_s27 = smov 8  }
 0x279   : > { %1053 = dma.vmem_to_hbm [thread:$0]  (%p1310_p3), %s1411_s24, 1024, %s1409_s28, %s1419_s29, %s1236_s16, %s1237_s15, %s1238_s27  }
 0x27a PF: > { %p1059_p5 = scmp.ge.s32.totalorder %s1227_s19, 2  ;;  %s838_s5 = sand.u32 1, %s1199_s12  }
 0x27b   : > { %s839_s6 = scalar_lea.sflag [#allocation4], %s838_s5 }
 0x27c   : > { %p1056_p6 = pnand %p1059_p5, %p1319_p8 }
 0x27e   : > { %1194 = dma.done.wait (!%p1056_p6), %s839_s6, 1024  }
 0x27f   : > { %1196 = vsyncadd (!%p1056_p6), %s839_s6, 4294966272  ;;  %s16_s19 = sadd.s32 1, %s1227_s19   ;;  %s1477_s12 = smov %s1203_s13 }
 0x280   : > { %p13_p7 = scmp.ge.s32.totalorder %s16_s19, 6   ;;  %s1478_s13 = smov %s1207_s14 }
 0x281   : > { %s1479_s14 = smov %s1328_s30  ;;  %s1480_s15 = smov %s1219_s17 }
 0x282   : > { %s1481_s16 = smov %s1223_s18  ;;  %s1482_s17 = smov %s1485_s22 }
 0x283   : > { %s1483_s18 = smov %s1489_s23  ;;  %15 = sbr.rel (!%p13_p7) target bundleno = 5 (0x5), region = 84 }
 0x28a   :  { %844 = vsyncpa [#allocation4], 1 }
 0x28b   :  { %846 = vsyncpa [#allocation4 + $0x1], 1 }

</bundles_post_ra>
